<compile_context>
chip_gen: v6e
topology: v6e:2x2x1
jax: 0.10.0
libtpu: 0.0.40
codegen_flags: <defaults>
</compile_context>

<pallas_src>
import functools

import jax
import jax.numpy as jnp
from jax.experimental import pallas as pl
from jax.experimental.pallas import tpu as pltpu


# --------------------------------------------------------------------------- kernels

def _ffn_kernel_scratch_acc(x_ref, w1_ref, wg_ref, w2_ref, o_ref, acc_ref):
    """Variant with a dedicated f32 accumulator (used when the output dtype != f32)."""
    j = pl.program_id(1)

    @pl.when(j == 0)
    def _init():
        acc_ref[...] = jnp.zeros_like(acc_ref)

    x = x_ref[...].astype(w1_ref.dtype)          # matmul operand dtype = weight dtype
    h1 = jnp.dot(x, w1_ref[...], preferred_element_type=jnp.float32)
    hg = jnp.dot(x, wg_ref[...], preferred_element_type=jnp.float32)
    swi = (h1 * jax.nn.sigmoid(h1)) * hg         # SwiGLU elementwise math in f32
    acc_ref[...] += jnp.dot(swi.astype(w2_ref.dtype), w2_ref[...],
                            preferred_element_type=jnp.float32)

    @pl.when(j == pl.num_programs(1) - 1)
    def _finalize():
        o_ref[...] = acc_ref[...].astype(o_ref.dtype)


def _ffn_kernel_acc_in_out(x_ref, w1_ref, wg_ref, w2_ref, o_ref):
    """Variant accumulating directly in the resident f32 output block (saves tm*E*4 B VMEM)."""
    j = pl.program_id(1)

    x = x_ref[...].astype(w1_ref.dtype)
    h1 = jnp.dot(x, w1_ref[...], preferred_element_type=jnp.float32)
    hg = jnp.dot(x, wg_ref[...], preferred_element_type=jnp.float32)
    swi = (h1 * jax.nn.sigmoid(h1)) * hg
    part = jnp.dot(swi.astype(w2_ref.dtype), w2_ref[...],
                   preferred_element_type=jnp.float32)

    @pl.when(j == 0)
    def _init():
        o_ref[...] = part

    @pl.when(j > 0)
    def _accum():
        o_ref[...] += part


# --------------------------------------------------------------------- tile planning

def _vmem_capacity_bytes():
    try:
        info = pltpu.get_tpu_info()
        cap = getattr(info, "vmem_capacity_bytes", None)
        if cap:
            return int(cap)
    except Exception:
        pass
    return 64 << 20          # conservative default (v7x: 64 MiB per TensorCore)


def _round_up(a, b):
    return -(-a // b) * b


def _pick_tf(F, tf_req):
    """Largest multiple-of-128 divisor of F that is <= tf_req; tiny/irregular F -> F."""
    if F % 128 != 0:
        return F
    cand = min(max(tf_req, 128), F)
    cand -= cand % 128
    while cand >= 128:
        if F % cand == 0:
            return cand
        cand -= 128
    return F


def _plan_tiles(M, E, F, x_isz, w_isz, out_isz, vmem_cap, tm_req, tf_req,
                m_align, scratch_acc):
    tf = _pick_tf(F, tf_req)
    budget = int(vmem_cap * 0.75)      # headroom for compiler-internal scratch

    def plan_bytes(tm, tf):
        b = (2 * tm * E * x_isz        # x tile, double-buffered
             + 2 * 2 * E * tf * w_isz  # fc1 + gate weight tiles, double-buffered
             + 2 * tf * E * w_isz      # fc2 weight tile, double-buffered
             + 2 * tm * E * out_isz    # output tile, double-buffered
             + 3 * tm * tf * 4)        # f32 h1 / hg / swiglu intermediates
        if scratch_acc:
            b += tm * E * 4            # f32 accumulator scratch
        return b

    # Largest sublane-aligned row tile <= tm_req that fits the VMEM budget.
    tm = max(m_align, (min(tm_req, 1024) // m_align) * m_align)
    while tm > m_align and plan_bytes(tm, tf) > budget:
        tm = max(m_align, ((tm // 2) // m_align) * m_align)

    # Don't tile wider than the (aligned) problem; balance tiles so that padding and
    # wasted MXU rows in the last tile are minimal.
    tm = min(tm, _round_up(M, m_align))
    n_m = -(-M // tm)
    if n_m == 1 and M >= 2 * m_align:
        n_m = 2                        # >= 2 row tiles so the parallel axis spans both v7x TCs
    tm = _round_up(-(-M // n_m), m_align)
    m_pad = n_m * tm
    return tm, tf, m_pad, plan_bytes(tm, tf)


# -------------------------------------------------------------------------- wrapper

@functools.partial(jax.jit, static_argnames=("tm", "tf"))
def feed_forward_network(x, w1, wg, w2, *, tm=None, tf=None):
    """SwiGLU FFN: fc2(silu(fc1(x)) * gate(x)).

    x:  (..., E)   activations (any float dtype; output matches it)
    w1: (E, F)     fc1 weight (pre-transposed vs PyTorch's (F, E))
    wg: (E, F)     gate weight (pre-transposed)
    w2: (F, E)     fc2 weight (pre-transposed)

    Matmul operands run in the *weight* dtype (pre-cast weights to bf16 once at init
    for the fast MXU path); accumulation and SwiGLU math are always f32.
    """
    x_shape = x.shape
    out_dtype = x.dtype
    E = x_shape[-1]
    F = w1.shape[1]
    x2d = x.reshape(-1, E)
    M = x2d.shape[0]

    x_isz = x2d.dtype.itemsize
    w_isz = w1.dtype.itemsize
    out_isz = jnp.dtype(out_dtype).itemsize
    m_align = {4: 8, 2: 16, 1: 32}.get(x_isz, 8)   # sublane packing of x / out blocks

    vmem_cap = _vmem_capacity_bytes()
    big_vmem = vmem_cap >= (100 << 20)             # v5e / v6e (128 MiB) vs v7x (64 MiB)
    if tm is None:
        tm = 512 if big_vmem else 256
    if tf is None:
        tf = 512 if big_vmem else 256

    scratch_acc = out_dtype != jnp.float32
    tm_eff, tf_eff, m_pad, est_vmem = _plan_tiles(
        M, E, F, x_isz, w_isz, out_isz, vmem_cap, tm, tf, m_align, scratch_acc)

    if m_pad != M:
        x2d = jnp.pad(x2d, ((0, m_pad - M), (0, 0)))

    grid = (m_pad // tm_eff, F // tf_eff)
    n_m = grid[0]

    cost = pl.CostEstimate(
        flops=6 * M * E * F,                           # three (M,E)x(E,F)-class matmuls
        transcendentals=M * F,                         # sigmoid
        bytes_accessed=int(m_pad * E * x_isz
                           # weights are re-streamed once per row tile:
                           + n_m * (w1.size + wg.size + w2.size) * w_isz
                           + m_pad * E * out_isz),
    )

    kernel = _ffn_kernel_scratch_acc if scratch_acc else _ffn_kernel_acc_in_out
    scratch_shapes = [pltpu.VMEM((tm_eff, E), jnp.float32)] if scratch_acc else []

    out2d = pl.pallas_call(
        kernel,
        out_shape=jax.ShapeDtypeStruct((m_pad, E), out_dtype),
        grid_spec=pltpu.PrefetchScalarGridSpec(
            num_scalar_prefetch=0,
            grid=grid,
            in_specs=[
                pl.BlockSpec((tm_eff, E), lambda i, j: (i, 0)),   # x row tile
                pl.BlockSpec((E, tf_eff), lambda i, j: (0, j)),   # fc1 weight tile
                pl.BlockSpec((E, tf_eff), lambda i, j: (0, j)),   # gate weight tile
                pl.BlockSpec((tf_eff, E), lambda i, j: (j, 0)),   # fc2 weight tile
            ],
            out_specs=pl.BlockSpec((tm_eff, E), lambda i, j: (i, 0)),
            scratch_shapes=scratch_shapes,
        ),
        compiler_params=pltpu.CompilerParams(
            dimension_semantics=("parallel", "arbitrary"),
            vmem_limit_bytes=int(min(max(est_vmem * 5 // 4, 32 << 20), vmem_cap)),
        ),
        cost_estimate=cost,
    )(x2d, w1, wg, w2)

    return out2d[:M].reshape(x_shape)


# ------------------------------------------------------------------------- reference

def reference_ffn(x, w1, wg, w2):
    x2d = x.reshape(-1, x.shape[-1]).astype(jnp.float32)
    h1 = x2d @ w1.astype(jnp.float32)
    hg = x2d @ wg.astype(jnp.float32)
    swi = (h1 * jax.nn.sigmoid(h1)) * hg
    out = swi @ w2.astype(jnp.float32)
    return out.reshape(x.shape)


if __name__ == "__main__":
    # Small shapes consistent with the module: x (B, S, E), embed_dim=32, ffn_dim=64.
    B, S, E, FFN = 2, 8, 32, 64
    key = jax.random.PRNGKey(0)
    kx, k1, kg, k2 = jax.random.split(key, 4)

    x = jax.random.normal(kx, (B, S, E), dtype=jnp.float32)
    w1 = jax.random.normal(k1, (E, FFN), dtype=jnp.float32) * (E ** -0.5)
    wg = jax.random.normal(kg, (E, FFN), dtype=jnp.float32) * (E ** -0.5)
    w2 = jax.random.normal(k2, (FFN, E), dtype=jnp.float32) * (FFN ** -0.5)

    ref = reference_ffn(x, w1, wg, w2)

    # f32 weights / f32 activations (accumulates directly in the output block).
    out = feed_forward_network(x, w1, wg, w2)
    jax.block_until_ready(out)
    assert out.shape == x.shape
    assert jnp.allclose(out, ref, atol=1e-4, rtol=1e-4), "f32 mismatch vs reference"

    # Fast path: weights pre-cast to bf16 ONCE (no per-call casts inside the kernel call).
    w1_b, wg_b, w2_b = (w.astype(jnp.bfloat16) for w in (w1, wg, w2))
    out_bf16w = feed_forward_network(x, w1_b, wg_b, w2_b)
    jax.block_until_ready(out_bf16w)
    assert jnp.allclose(out_bf16w, ref, atol=5e-2, rtol=5e-2), "bf16-weight mismatch"

    # bf16 activations + bf16 weights (exercises the scratch-accumulator kernel).
    out_bf16 = feed_forward_network(x.astype(jnp.bfloat16), w1_b, wg_b, w2_b)
    jax.block_until_ready(out_bf16)
    assert out_bf16.dtype == jnp.bfloat16
    assert jnp.allclose(out_bf16.astype(jnp.float32), ref, atol=1e-1, rtol=1e-1), \
        "bf16 mismatch vs reference"

    # Larger sanity check exercising both grid axes (balanced row tiles + F accumulation).
    M2, E2, F2 = 300, 128, 256
    kx2, k12, kg2, k22 = jax.random.split(jax.random.PRNGKey(1), 4)
    x2 = jax.random.normal(kx2, (M2, E2), dtype=jnp.float32)
    w1b = jax.random.normal(k12, (E2, F2), dtype=jnp.float32) * (E2 ** -0.5)
    wgb = jax.random.normal(kg2, (E2, F2), dtype=jnp.float32) * (E2 ** -0.5)
    w2b = jax.random.normal(k22, (F2, E2), dtype=jnp.float32) * (F2 ** -0.5)
    out2 = feed_forward_network(x2, w1b, wgb, w2b, tm=128, tf=128)
    jax.block_until_ready(out2)
    ref2 = reference_ffn(x2, w1b, wgb, w2b)
    assert jnp.allclose(out2, ref2, atol=1e-3, rtol=1e-3), "tiled mismatch vs reference"

    print("KERNEL_OK")
</pallas_src>

<mosaic_0001>
module attributes {stable_mosaic.version = 11 : i64} {
  func.func @_ffn_kernel_acc_in_out(%arg0: i32, %arg1: i32, %arg2: memref<8x32xf32, #tpu.memory_space<vmem>>, %arg3: memref<32x64xf32, #tpu.memory_space<vmem>>, %arg4: memref<32x64xf32, #tpu.memory_space<vmem>>, %arg5: memref<64x32xf32, #tpu.memory_space<vmem>>, %arg6: memref<8x32xf32, #tpu.memory_space<vmem>>) attributes {dimension_semantics = [#tpu.dimension_semantics<parallel>, #tpu.dimension_semantics<arbitrary>], iteration_bounds = array<i64: 2, 1>, scalar_prefetch = 0 : i64, scratch_operands = 0 : i64, tpu.core_type = #tpu.core_type<tc>, window_params = [{transform_indices = @transform_0, window_bounds = array<i64: 8, 32>}, {transform_indices = @transform_1, window_bounds = array<i64: 32, 64>}, {transform_indices = @transform_2, window_bounds = array<i64: 32, 64>}, {transform_indices = @transform_3, window_bounds = array<i64: 64, 32>}, {transform_indices = @transform_4, window_bounds = array<i64: 8, 32>}]} {
    %c0 = arith.constant 0 : index
    %c0_0 = arith.constant 0 : index
    %0 = vector.load %arg2[%c0, %c0_0] : memref<8x32xf32, #tpu.memory_space<vmem>>, vector<8x32xf32>
    %c0_1 = arith.constant 0 : index
    %c0_2 = arith.constant 0 : index
    %1 = vector.load %arg3[%c0_1, %c0_2] : memref<32x64xf32, #tpu.memory_space<vmem>>, vector<32x64xf32>
    %cst = arith.constant dense<0.000000e+00> : vector<8x64xf32>
    %2 = tpu.matmul %0, %1, %cst {dimension_numbers = #tpu.dot_dimension_numbers<[1], [0], [0], [1], [0, 0, 1, 1], [], []>} : vector<8x32xf32>, vector<32x64xf32>, vector<8x64xf32> -> vector<8x64xf32>
    %c0_3 = arith.constant 0 : index
    %c0_4 = arith.constant 0 : index
    %3 = vector.load %arg4[%c0_3, %c0_4] : memref<32x64xf32, #tpu.memory_space<vmem>>, vector<32x64xf32>
    %cst_5 = arith.constant dense<0.000000e+00> : vector<8x64xf32>
    %4 = tpu.matmul %0, %3, %cst_5 {dimension_numbers = #tpu.dot_dimension_numbers<[1], [0], [0], [1], [0, 0, 1, 1], [], []>} : vector<8x32xf32>, vector<32x64xf32>, vector<8x64xf32> -> vector<8x64xf32>
    %5 = arith.negf %2 : vector<8x64xf32>
    %6 = math.exp %5 : vector<8x64xf32>
    %cst_6 = arith.constant 1.000000e+00 : f32
    %7 = vector.broadcast %cst_6 : f32 to vector<8x64xf32>
    %8 = arith.addf %7, %6 : vector<8x64xf32>
    %9 = arith.divf %7, %8 : vector<8x64xf32>
    %10 = arith.mulf %2, %9 : vector<8x64xf32>
    %11 = arith.mulf %10, %4 : vector<8x64xf32>
    %c0_7 = arith.constant 0 : index
    %c0_8 = arith.constant 0 : index
    %12 = vector.load %arg5[%c0_7, %c0_8] : memref<64x32xf32, #tpu.memory_space<vmem>>, vector<64x32xf32>
    %cst_9 = arith.constant dense<0.000000e+00> : vector<8x32xf32>
    %13 = tpu.matmul %11, %12, %cst_9 {dimension_numbers = #tpu.dot_dimension_numbers<[1], [0], [0], [1], [0, 0, 1, 1], [], []>} : vector<8x64xf32>, vector<64x32xf32>, vector<8x32xf32> -> vector<8x32xf32>
    %c0_i32 = arith.constant 0 : i32
    %14 = arith.cmpi eq, %arg1, %c0_i32 : i32
    %15 = arith.extui %14 : i1 to i32
    %c0_i32_10 = arith.constant 0 : i32
    %16 = arith.cmpi ne, %15, %c0_i32_10 : i32
    scf.if %16 {
      %c0_13 = arith.constant 0 : index
      %c0_14 = arith.constant 0 : index
      %20 = vector.load %arg6[%c0_13, %c0_14] : memref<8x32xf32, #tpu.memory_space<vmem>>, vector<8x32xf32>
      tpu.vector_store %arg6[%c0_13, %c0_14], %13 {strides = array<i32>} : memref<8x32xf32, #tpu.memory_space<vmem>>, vector<8x32xf32>,
    } else {
    }
    %c0_i32_11 = arith.constant 0 : i32
    %17 = arith.cmpi sgt, %arg1, %c0_i32_11 : i32
    %18 = arith.extui %17 : i1 to i32
    %c0_i32_12 = arith.constant 0 : i32
    %19 = arith.cmpi ne, %18, %c0_i32_12 : i32
    scf.if %19 {
      %c0_13 = arith.constant 0 : index
      %c0_14 = arith.constant 0 : index
      %20 = vector.load %arg6[%c0_13, %c0_14] : memref<8x32xf32, #tpu.memory_space<vmem>>, vector<8x32xf32>
      %21 = arith.addf %20, %13 : vector<8x32xf32>
      %c0_15 = arith.constant 0 : index
      %c0_16 = arith.constant 0 : index
      %22 = vector.load %arg6[%c0_15, %c0_16] : memref<8x32xf32, #tpu.memory_space<vmem>>, vector<8x32xf32>
      tpu.vector_store %arg6[%c0_15, %c0_16], %21 {strides = array<i32>} : memref<8x32xf32, #tpu.memory_space<vmem>>, vector<8x32xf32>,
    } else {
    }
    return
  }
  func.func @transform_0(%arg0: i32, %arg1: i32) -> (i32, i32) {
    %c0_i32 = arith.constant 0 : i32
    %c0_i32_0 = arith.constant 0 : i32
    return %arg0, %c0_i32 : i32, i32
  }
  func.func @transform_1(%arg0: i32, %arg1: i32) -> (i32, i32) {
    %c0_i32 = arith.constant 0 : i32
    %c0_i32_0 = arith.constant 0 : i32
    return %c0_i32, %arg1 : i32, i32
  }
  func.func @transform_2(%arg0: i32, %arg1: i32) -> (i32, i32) {
    %c0_i32 = arith.constant 0 : i32
    %c0_i32_0 = arith.constant 0 : i32
    return %c0_i32, %arg1 : i32, i32
  }
  func.func @transform_3(%arg0: i32, %arg1: i32) -> (i32, i32) {
    %c0_i32 = arith.constant 0 : i32
    %c0_i32_0 = arith.constant 0 : i32
    return %arg1, %c0_i32 : i32, i32
  }
  func.func @transform_4(%arg0: i32, %arg1: i32) -> (i32, i32) {
    %c0_i32 = arith.constant 0 : i32
    %c0_i32_0 = arith.constant 0 : i32
    return %arg0, %c0_i32 : i32, i32
  }
}

</mosaic_0001>

<bundles_post_ra>
// kernel: feed_forward_network.1
= control target key start
LH: loop header
LB: loop body
LE: loop exit
PB: predicated region body
PF: predicated region fallthrough
CT: control target
= control target key end

     0   :  { %9 = vsyncpa [#allocation3], 0  ;;  %s1052_s0 = inlined_call_operand.vmem [shape: f32[16,32], index: 0, kind: input, shape index: {}]   ;;  %s1053_s1 = inlined_call_operand.vmem [shape: f32[32,64], index: 1, kind: input, shape index: {}]   ;;  %s1054_s2 = inlined_call_operand.vmem [shape: f32[32,64], index: 2, kind: input, shape index: {}]   ;;  %s1055_s3 = inlined_call_operand.vmem [shape: f32[64,32], index: 3, kind: input, shape index: {}]   ;;  %s1056_s4 = inlined_call_operand.hbm [shape: f32[16,32], index: 4, kind: output, shape index: {}]  }
   0x1   :  { %11 = vsyncpa [#allocation3 + $0x1], 0  ;;  %s887_s15 = smov 0   ;;  %s889_s16 = smov 0  }
   0x2   :  { %s891_s17 = smov 0   ;;  %s893_s18 = smov 0  }
   0x3   :  { %s895_s19 = smov 0   ;;  %s897_s20 = smov 0  }
   0x4 LB: > { %s642_s21 = sadd.s32 4294967295, %s857_s20   ;;  %s643_s22 = sadd.s32 4294967294, %s857_s20   ;;  %s857_s20 = sphi %s897_s20, %s17_s20   ;;  %s853_s19 = sphi %s895_s19, %s1063_s19   ;;  %s849_s18 = sphi %s893_s18, %s1062_s18   ;;  %s845_s17 = sphi %s891_s17, %s1061_s17   ;;  %s841_s16 = sphi %s889_s16, %s1060_s16   ;;  %s837_s15 = sphi %s887_s15, %s1059_s15  }
   0x5   : > { %s29_s23 = sadd.s32 1, %s853_s19  ;;  %s140_s24 = sadd.s32 1, %s845_s17 }
   0x6   : > { %p31_p0 = scmp.ge.s32.totalorder %s29_s23, 2  ;;  %p150_p1 = scmp.ne.s32.totalorder %s845_s17, %s841_s16 }
   0x7   : > { %p151_p2 = scmp.eq.s32.totalorder %s642_s21, 1  ;;  %p156_p3 = scmp.ne.s32.totalorder %s841_s16, %s837_s15 }
   0x8   : > { %s1065_s23 = smov (%p31_p0, %s29_s23), 0  ;;  %p157_p5 = scmp.eq.s32.totalorder %s643_s22, 1 }
   0x9   : > { %p927_p4 = por %p151_p2, %p150_p1  ;;  %s137_s26 = ssub.s32 %s853_s19, %s1065_s23 }
   0xa   : > { %p649_p6 = scmp.ge.s32.totalorder %s857_s20, 1  ;;  %p138_p7 = scmp.eq.s32.totalorder %s137_s26, 0 }
   0xb   : > { %p934_p8 = por %p157_p5, %p156_p3  ;;  %p205_p9 = scmp.lt.s32.totalorder %s857_s20, 3 }
   0xc   : > { %s940_s28 = scalar_select %p138_p7, %s845_s17, %s140_s24  }
   0xd   : > { %p206_p10 = pnand %p649_p6, %p205_p9 }
   0xe   : > { %p243_p11 = scmp.lt.s32.totalorder (!%p206_p10), %s849_s18, 1  ;;  %s240_s8 = sand.u32 (!%p206_p10), 1, %s841_s16  }
   0xf   : > { %209 = sbr.rel (%p206_p10) target bundleno = 465 (0x1d1), region = 36  ;;  %s650_s9 = sshll.u32 (!%p206_p10), %s240_s8, 3 }
  0x10   : > { %s242_s11 = scalar_lea.vmem (!%p206_p10), [#allocation2], %s650_s9  ;;  %s517_s22 = scalar_lea.sflag (!%p206_p10), [#allocation3], %s240_s8 }
  0x11   : > { %s530_s12 = sshll.u32 (!%p206_p10), %s242_s11, 4  ;;  %s1007_s12 = int_to_ptr.vmem [resolvable:$true] %s530_s12 }
  0x12   : > { %s781_s24 = scalar_lea.vmem (!%p206_p10), %s1007_s12, 128 }
  0x13   : > { %p782_p12 = scmp.ne.s32.totalorder (!%p206_p10), %s1007_s12, %s781_s24 }
  0x14   : > { %v265_v0 = vld [vmem:[%s1053_s1 + $0x18] sm:$0xff]  ;;  %v859_v1 = vmov 0.0   ;;  %v264_v2 = vld [vmem:[%s1053_s1 + $0x10] sm:$0xff]  ;;  %vm860_vm0 = vmmov 0   ;;  %s244_s7 = scalar_select %p243_p11, %s849_s18, 1  ;;  %v263_v3 = vld [vmem:[%s1053_s1 + $0x8] sm:$0xff] }
  0x15   : > { %679 = vmatprep.subr.mxu1 %v859_v1  ;;  %687 = vmatprep.mubr.msk.f32.mxu1 %vm860_vm0, %v859_v1  ;;  %v262_v4 = vld [vmem:[%s1053_s1] sm:$0xff]  ;;  %vm266_vm1 = vcmask 261120   ;;  %v343_v6 = vld [vmem:[%s1054_s2 + $0x18] sm:$0xff]  ;;  %v342_v7 = vld [vmem:[%s1054_s2 + $0x10] sm:$0xff]  ;;  %vm430_vm2 = vcmask 523264   ;;  %p783_p13 = pnand %p782_p12, %p927_p4 }
  0x16   : > { %680 = vmatpush3.msra.mxu1 %v265_v0  ;;  %701 = vmatprep.subr.mxu0 %v859_v1  ;;  %s651_s10 = sshll.u32 %s244_s7, 3  ;;  %v341_v8 = vld [vmem:[%s1054_s2 + $0x8] sm:$0xff]  ;;  %v340_v9 = vld [vmem:[%s1054_s2] sm:$0xff]  ;;  %v429_v10 = vld [vmem:[%s1055_s3 + $0x38] sm:$0xff] }
  0x17   : > { %681 = vmatprep.subr.mxu1 %v859_v1  ;;  %717 = vmatprep.mubr.msk.f32.mxu0 %vm860_vm0, %v859_v1  ;;  %s246_s21 = scalar_lea.vmem %s1052_s0, %s651_s10  ;;  %v428_v11 = vld [vmem:[%s1055_s3 + $0x30] sm:$0xff]  ;;  %v427_v12 = vld [vmem:[%s1055_s3 + $0x28] sm:$0xff]  ;;  %v426_v13 = vld [vmem:[%s1055_s3 + $0x20] sm:$0xff]  ;;  %s657_s10 = sshll.u32 %s849_s18, 7 }
  0x18   : > { %682 = vmatpush3.msra.mxu1 %v264_v2  ;;  %v261_v5 = vld [vmem:[%s246_s21] sm:$0xff]  ;;  %702 = vmatpush3.msra.mxu0 %v429_v10  ;;  %v425_v14 = vld [vmem:[%s1055_s3 + $0x18] sm:$0xff]  ;;  %v424_v15 = vld [vmem:[%s1055_s3 + $0x10] sm:$0xff]  ;;  %s1005_s21 = scalar_lea.hbm %s1056_s4, %s657_s10  ;;  %p784_p0 = pneg %p783_p13 }
  0x19   : > { %683 = vmatprep.subr.mxu1 %v859_v1  ;;  %703 = vmatprep.subr.mxu0 %v859_v1  ;;  %v423_v16 = vld [vmem:[%s1055_s3 + $0x8] sm:$0xff]  ;;  %v422_v17 = vld [vmem:[%s1055_s3] sm:$0xff]  ;;  %s861_s18 = smov [#allocation2]  }
  0x1a   : > { %684 = vmatpush3.msra.mxu1 %v263_v3  ;;  %704 = vmatpush3.msra.mxu0 %v428_v11  ;;  %s785_s26 = sshll.u32 %s861_s18, 4  ;;  %s786_s26 = int_to_ptr.vmem [resolvable:$false] %s785_s26 }
  0x1b   : > { %685 = vmatprep.subr.mxu1 %v859_v1  ;;  %705 = vmatprep.subr.mxu0 %v859_v1  ;;  %s787_s29 = scalar_lea.vmem %s786_s26, 256  ;;  %p788_p1 = scmp.lt.s32.totalorder %s1007_s12, %s786_s26 }
  0x1c   : > { %686 = vmatpush3.msra.mxu1 %v262_v4  ;;  %706 = vmatpush3.msra.mxu0 %v427_v12  ;;  %p789_p2 = scmp.lt.s32.totalorder %s787_s29, %s781_s24 }
  0x1d   : > { %688 = vmatmul.mubr.msk.f32.vlgmr.msra.gmra.mxu1 %vm266_vm1, %v261_v5  ;;  %690 = vmatprep.subr.mxu1 %v859_v1 }
  0x1e   : > { %691 = vmatpush3.msra.mxu1 %v343_v6  ;;  %698 = vmatprep.mubr.msk.f32.mxu1 %vm860_vm0, %v859_v1  ;;  %p790_p3 = por %p789_p2, %p788_p1 }
  0x1f   : > { %692 = vmatprep.subr.mxu1 %v859_v1  ;;  %707 = vmatprep.subr.mxu0 %v859_v1 }
  0x20   : > { %693 = vmatpush3.msra.mxu1 %v342_v7  ;;  %708 = vmatpush3.msra.mxu0 %v426_v13  ;;  %p791_p5 = pnand %p790_p3, %p784_p0 }
  0x21   : > { %694 = vmatprep.subr.mxu1 %v859_v1  ;;  %709 = vmatprep.subr.mxu0 %v859_v1 }
  0x22   : > { %695 = vmatpush3.msra.mxu1 %v341_v8  ;;  %710 = vmatpush3.msra.mxu0 %v425_v14 }
  0x23   : > { %696 = vmatprep.subr.mxu1 %v859_v1  ;;  %711 = vmatprep.subr.mxu0 %v859_v1 }
  0x24   : > { %697 = vmatpush3.msra.mxu1 %v340_v9  ;;  %712 = vmatpush3.msra.mxu0 %v424_v15 }
  0x25   : > { %699 = vmatmul.mubr.msk.f32.vlgmr.msra.gmra.mxu1 %vm266_vm1, %v261_v5  ;;  %713 = vmatprep.subr.mxu0 %v859_v1 }
  0x26   : > { %714 = vmatpush3.msra.mxu0 %v423_v16 }
  0x27   : > { %715 = vmatprep.subr.mxu0 %v859_v1 }
  0x28   : > { %716 = vmatpush3.msra.mxu0 %v422_v17 }
  0xdd   : > { %v336_v18 = vpop.f32.mrf.mxu1 }
  0xde   : > { %v654_v19 = vmul.f32 -1.442695, %v336_v18 }
  0xdf   : > { %v689_v20 = vpop.f32.mrf.mxu1 }
  0xe0   : > { %777 = vpow2.f32 %v654_v19 }
  0xe5   : > { %v410_v21 = vpop.f32.mrf.mxu1 }
  0xe7   : > { %v700_v22 = vpop.f32.mrf.mxu1 }
  0xed   : > { %v778_v23 = vpop.eup %777 }
  0xee   : > { %v417_v24 = vadd.f32 1.0, %v778_v23 }
  0xf0   : > { %779 = vrcp.f32 %v417_v24 }
  0xfd   : > { %v780_v25 = vpop.eup %779 }
  0xfe   : > { %v420_v26 = vmul.f32 %v780_v25, %v336_v18 }
 0x100   : > { %v421_v27 = vmul.f32 %v420_v26, %v410_v21 }
 0x102   : > { %718 = vmatmul.mubr.msk.f32.vlgmr.msra.gmra.mxu0 %vm430_vm2, %v421_v27 }
 0x1c2   : > { %v500_v28 = vpop.f32.mrf.mxu0 }
 0x1c3   : > { %508 = vst.msk [vmem:[%s242_s11] sm:$0xff] %vm266_vm1, %v500_v28 }
 0x1c4   : > { %v719_v29 = vpop.f32.mrf.mxu0 }
 0x1c5   : > { %794 = shalt.err (!%p791_p5)
}
 0x1c6   : > { %s795_s30 = scalar_lea.hbm %s1005_s21, 128  ;;  %s799_s7 = scalar_lea.hbm %s1056_s4, 256 }
 0x1c7   : > { %p796_p6 = scmp.ne.s32.totalorder %s1005_s21, %s795_s30  ;;  %p800_p10 = scmp.lt.s32.totalorder %s1005_s21, %s1056_s4 }
 0x1c8   : > { %p801_p11 = scmp.lt.s32.totalorder %s799_s7, %s795_s30 }
 0x1c9   : > { %p797_p7 = pnand %p796_p6, %p927_p4 }
 0x1ca   : > { %p802_p12 = por %p801_p11, %p800_p10 }
 0x1cb   : > { %p798_p9 = pneg %p797_p7 }
 0x1cd   : > { %p803_p13 = pnand %p802_p12, %p798_p9 }
 0x1cf   : > { %806 = shalt.err (!%p803_p13)
}
 0x1d0   : > { %720 = dma.vmem_to_hbm [thread:$0]  (%p927_p4), %s1007_s12, 128, %s1005_s21, %s517_s22  }
 0x1d1 PF: > { %p726_p0 = scmp.ge.s32.totalorder %s857_s20, 2  ;;  %s542_s10 = sand.u32 1, %s837_s15  }
 0x1d2   : > { %s543_s11 = scalar_lea.sflag [#allocation3], %s542_s10 }
 0x1d3   : > { %p723_p1 = pnand %p726_p0, %p934_p8 }
 0x1d5   : > { %p724_p2 = pneg %p723_p1 }
 0x1d7   : > { %832 = dma.done.wait (%p724_p2), %s543_s11, 128  }
 0x1d8   : > { %834 = vsyncadd (%p724_p2), %s543_s11, 4294967168  ;;  %s17_s20 = sadd.s32 1, %s857_s20   ;;  %s1059_s15 = smov %s841_s16 }
 0x1d9   : > { %p14_p3 = scmp.ge.s32.totalorder %s17_s20, 4   ;;  %s1060_s16 = smov %s845_s17 }
 0x1da   : > { %s1061_s17 = smov %s940_s28  ;;  %s1062_s18 = smov %s853_s19 }
 0x1db   : > { %s1063_s19 = smov %s1065_s23  ;;  %16 = sbr.rel (!%p14_p3) target bundleno = 4 (0x4), region = 88 }
 0x1e0   :  { %548 = vsyncpa [#allocation3], 1 }
 0x1e1   :  { %550 = vsyncpa [#allocation3 + $0x1], 1 }

</bundles_post_ra>
